<compile_context>
chip_gen: v5e
topology: v5e:2x2
jax: 0.10.0
libtpu: 0.0.40
codegen_flags: <defaults>
</compile_context>

<pallas_src>
import math

import jax
import jax.numpy as jnp
from jax.experimental import pallas as pl
from jax.experimental.pallas import tpu as pltpu

# ----------------------------- config (small) --------------------------------
B = 2            # batch
C_IN = 3         # image channels
H = W = 16       # spatial
PATCH = 8        # conv1 kernel = stride
NP = (H // PATCH) * (W // PATCH)          # 4 patches
EMBD_DIM = 32    # args['embd_dim']  (ViT width)
OUT_DIM = 32     # image_encoder.output_dim == text projection dim
CLASS_NUM = 10   # e.g. cifar10
LAYER_NUM = 4    # image_encoder.layers
PROMPT_LEN = 4   # args['prompt_length']
PROMPT_LEN_C = 4  # args['prompt_length_c']
CTX_DIM = 48     # stand-in prompt context dim
PATCH_K = C_IN * PATCH * PATCH            # 192
SIM_LANES = 128  # lane-dense slab for the two scalar sims
EPS = 1e-12


# ------------------------------ fused kernel ----------------------------------
def _lore_fused_kernel(xp_ref, pool_ref, lpw_ref, wbh_ref, wbpm_ref,
                       ctx_ref, tproj_ref, clsg_ref, vproj_ref,
                       clsw_ref, clsb_ref, oht_ref, ohp_ref, msk_ref,
                       logits_ref, feat_ref, sims_ref):
    f32 = jnp.float32

    def l2norm(x):
        # rsqrt -> EUP slot; +eps kills 0/0 on degenerate rows.
        return x * jax.lax.rsqrt(jnp.sum(x * x, axis=-1, keepdims=True) + EPS)

    def sum_all(x):
        # lane reduce, then sublane reduce -> (1, 1)
        return jnp.sum(jnp.sum(x, axis=-1, keepdims=True),
                       axis=0, keepdims=True)

    # image_tokens = linear_projection(image)  (Conv2d k=s=PATCH as matmul)
    img_tok = jnp.dot(xp_ref[...], lpw_ref[...],
                      preferred_element_type=f32)                # [B*Np, D]

    # White_box stand-in: pool tokens per image, project.
    # TODO(synk): real White_box_module is a stochastic GCN over image tokens.
    pooled = jnp.dot(pool_ref[...], img_tok,
                     preferred_element_type=f32)                 # [B, D]
    hidden = jnp.dot(pooled, wbh_ref[...],
                     preferred_element_type=f32)                 # [B, OUT]
    # wb_prompt weight is pre-averaged over (layer, prompt_len_c) on host.
    local_mean = jnp.dot(pooled, wbpm_ref[...],
                         preferred_element_type=f32)             # [B, D]

    # text branch: prompts -> text_features -> L2 normalize
    # TODO(synk): real PromptLearner_* / CLIP text transformer.
    text_feat = jnp.dot(ctx_ref[...], tproj_ref[...],
                        preferred_element_type=f32)              # [C, OUT]
    cpk_norm = l2norm(text_feat)

    # image_encoder stand-in (only the CLS row reaches the outputs):
    #   cls_row = class_embedding + mean(global_p) + mean(local_aware_p)
    cls_row = clsg_ref[...] + local_mean                         # [B, D]
    img_feat = jnp.dot(cls_row, vproj_ref[...],
                       preferred_element_type=f32)               # [B, OUT]
    img_feat_n = l2norm(img_feat)
    feat_ref[...] = img_feat_n

    # classifier(logit_scale * features): scale folded into clsw on host.
    logits_ref[...] = (jnp.dot(img_feat_n, clsw_ref[...],
                               preferred_element_type=f32) + clsb_ref[...])

    # increase_sim / reduce_sim (gather via one-hot matmul, then normalize)
    hid_n = l2norm(hidden)
    key_t = l2norm(hidden + jnp.dot(oht_ref[...], cpk_norm,
                                    preferred_element_type=f32))  # [B, OUT]
    key_p = l2norm(hidden + jnp.dot(ohp_ref[...], cpk_norm,
                                    preferred_element_type=f32))  # [B, OUT]
    inv_n = 1.0 / float(feat_ref.shape[0])
    inc = sum_all(key_t * hid_n) * inv_n                          # (1, 1)
    red = sum_all(key_p * msk_ref[...] * hid_n) * inv_n           # (1, 1)

    # lane-dense scalar output: sims[0,0]=increase_sim, sims[0,1]=reduce_sim
    lane = jax.lax.broadcasted_iota(jnp.int32, (1, SIM_LANES), 1)
    sims_ref[...] = (inc * (lane == 0).astype(f32)
                     + red * (lane == 1).astype(f32))


# ------------------------------- LORE forward ---------------------------------
@jax.jit
def lore_forward(params, image, target, p_target):
    f32 = jnp.float32
    image = image.astype(f32)
    b, c, h, w = image.shape
    hp, wp = h // PATCH, w // PATCH

    # patch rows for the (stride=kernel) conv:  [B*Np, C*P*P]
    x_patch = image.reshape(b, c, hp, PATCH, wp, PATCH)
    x_patch = x_patch.transpose(0, 2, 4, 1, 3, 5)
    x_patch = x_patch.reshape(b * hp * wp, c * PATCH * PATCH)

    # per-image mean-pool matrix over patches (constant-folded under jit)
    pool_mat = jnp.kron(jnp.eye(b, dtype=f32),
                        jnp.full((1, hp * wp), 1.0 / (hp * wp), f32))

    # parameter-only host folding (tiny XLA ops, no HBM round-trips of activations)
    lp_w_mat = params["lp_w"].reshape(EMBD_DIM, -1).T.astype(f32)   # [C*P*P, D]
    wbh = params["wb_hidden_w"].astype(f32)                          # [D, OUT]
    wbpm = jnp.mean(
        params["wb_prompt_w"].reshape(EMBD_DIM, LAYER_NUM, PROMPT_LEN_C,
                                      EMBD_DIM),
        axis=(1, 2)).astype(f32)                                     # [D, D]
    ctx = params["prompt_ctx"].astype(f32)                           # [C, CTX]
    tproj = params["text_proj"].astype(f32)                          # [CTX, OUT]
    clsg = (params["class_embedding"]
            + jnp.mean(params["global_p"], axis=(0, 1)))[None, :].astype(f32)
    vproj = params["vit_proj"].astype(f32)                           # [D, OUT]
    logit_scale = jnp.exp(params["logit_scale"]).astype(f32)
    clsw = (logit_scale * params["cls_w"].astype(f32)).T             # [OUT, C]
    clsb = params["cls_b"].astype(f32)[None, :]                      # [1, C]
    oht = jax.nn.one_hot(target, CLASS_NUM, dtype=f32)               # [B, C]
    ohp = jax.nn.one_hot(p_target, CLASS_NUM, dtype=f32)             # [B, C]
    msk = (target != p_target).astype(f32)[:, None]                  # [B, 1]

    args = (x_patch, pool_mat, lp_w_mat, wbh, wbpm, ctx, tproj, clsg,
            vproj, clsw, clsb, oht, ohp, msk)

    in_specs = [pl.BlockSpec(a.shape, lambda i, nd=a.ndim: (0,) * nd)
                for a in args]
    out_shapes = (
        jax.ShapeDtypeStruct((b, CLASS_NUM), f32),    # logits
        jax.ShapeDtypeStruct((b, OUT_DIM), f32),      # normalized features
        jax.ShapeDtypeStruct((1, SIM_LANES), f32),    # [increase, reduce, 0...]
    )
    out_specs = tuple(pl.BlockSpec(s.shape, lambda i: (0, 0))
                      for s in out_shapes)

    logits, feats, sims = pl.pallas_call(
        _lore_fused_kernel,
        out_shape=out_shapes,
        grid=(1,),
        in_specs=in_specs,
        out_specs=out_specs,
        compiler_params=pltpu.CompilerParams(
            dimension_semantics=("arbitrary",)),
    )(*args)

    return {
        "logits": logits,                 # torch.cat of a single element
        "features": feats,
        "increase_sim": sims[0, 0],
        "reduce_sim": sims[0, 1],
    }


# ------------------------------ parameter init --------------------------------
def init_params(key):
    ks = jax.random.split(key, 12)
    std = 0.02
    conv1_w = std * jax.random.normal(ks[0], (EMBD_DIM, C_IN, PATCH, PATCH),
                                      jnp.float32)
    params = {
        # conv1_w is the visual-encoder patch conv; its tokens are dead code in
        # this stand-in forward (class_features_ unused), kept for fidelity.
        "conv1_w": conv1_w,
        "lp_w": conv1_w,  # copy.deepcopy(image_encoder.conv1) -> same values
        "class_embedding": std * jax.random.normal(ks[1], (EMBD_DIM,),
                                                   jnp.float32),
        "vit_proj": std * jax.random.normal(ks[2], (EMBD_DIM, OUT_DIM),
                                            jnp.float32),
        "global_p": std * jax.random.normal(
            ks[3], (LAYER_NUM, PROMPT_LEN, EMBD_DIM), jnp.float32),
        "cls_w": std * jax.random.normal(ks[4], (CLASS_NUM, OUT_DIM),
                                         jnp.float32),
        "cls_b": jnp.zeros((CLASS_NUM,), jnp.float32),
        "logit_scale": jnp.asarray(math.log(1.0 / 0.07), jnp.float32),
        "prompt_ctx": std * jax.random.normal(ks[5], (CLASS_NUM, CTX_DIM),
                                              jnp.float32),
        # unused by the stand-in text encoder (kept for structural fidelity)
        "tokenized_prompts": jnp.zeros((CLASS_NUM, 8), jnp.int32),
        "text_proj": std * jax.random.normal(ks[6], (CTX_DIM, OUT_DIM),
                                             jnp.float32),
        "wb_hidden_w": std * jax.random.normal(ks[7], (EMBD_DIM, OUT_DIM),
                                               jnp.float32),
        "wb_prompt_w": std * jax.random.normal(
            ks[8], (EMBD_DIM, LAYER_NUM * PROMPT_LEN_C * EMBD_DIM),
            jnp.float32),
    }
    return params


# ----------------------------------- main --------------------------------------
if __name__ == "__main__":
    key = jax.random.PRNGKey(0)
    k_param, k_img = jax.random.split(key)
    params = init_params(k_param)

    image = jax.random.normal(k_img, (B, C_IN, H, W), jnp.float32)
    target = jnp.array([1, 3], dtype=jnp.int32)
    p_target = jnp.array([1, 5], dtype=jnp.int32)

    out = lore_forward(params, image, target, p_target)
    jax.block_until_ready(out)

    assert out["logits"].shape == (B, CLASS_NUM)
    assert out["features"].shape == (B, OUT_DIM)
    assert out["increase_sim"].shape == ()
    assert out["reduce_sim"].shape == ()
    assert bool(jnp.all(jnp.isfinite(out["logits"])))
    print("KERNEL_OK")
</pallas_src>

<mosaic_0001>
module attributes {stable_mosaic.version = 11 : i64} {
  func.func @_lore_fused_kernel(%arg0: i32, %arg1: memref<8x192xf32, #tpu.memory_space<vmem>>, %arg2: memref<2x8xf32, #tpu.memory_space<vmem>>, %arg3: memref<192x32xf32, #tpu.memory_space<vmem>>, %arg4: memref<32x32xf32, #tpu.memory_space<vmem>>, %arg5: memref<32x32xf32, #tpu.memory_space<vmem>>, %arg6: memref<10x48xf32, #tpu.memory_space<vmem>>, %arg7: memref<48x32xf32, #tpu.memory_space<vmem>>, %arg8: memref<1x32xf32, #tpu.memory_space<vmem>>, %arg9: memref<32x32xf32, #tpu.memory_space<vmem>>, %arg10: memref<32x10xf32, #tpu.memory_space<vmem>>, %arg11: memref<1x10xf32, #tpu.memory_space<vmem>>, %arg12: memref<2x10xf32, #tpu.memory_space<vmem>>, %arg13: memref<2x10xf32, #tpu.memory_space<vmem>>, %arg14: memref<2x1xf32, #tpu.memory_space<vmem>>, %arg15: memref<2x10xf32, #tpu.memory_space<vmem>>, %arg16: memref<2x32xf32, #tpu.memory_space<vmem>>, %arg17: memref<1x128xf32, #tpu.memory_space<vmem>>) attributes {dimension_semantics = [#tpu.dimension_semantics<arbitrary>], iteration_bounds = array<i64: 1>, scalar_prefetch = 0 : i64, scratch_operands = 0 : i64, tpu.core_type = #tpu.core_type<tc>, window_params = [{pipeline_mode = #tpu.pipeline_mode<synchronous>, transform_indices = @transform_0, window_bounds = array<i64: 8, 192>}, {pipeline_mode = #tpu.pipeline_mode<synchronous>, transform_indices = @transform_1, window_bounds = array<i64: 2, 8>}, {pipeline_mode = #tpu.pipeline_mode<synchronous>, transform_indices = @transform_2, window_bounds = array<i64: 192, 32>}, {pipeline_mode = #tpu.pipeline_mode<synchronous>, transform_indices = @transform_3, window_bounds = array<i64: 32, 32>}, {pipeline_mode = #tpu.pipeline_mode<synchronous>, transform_indices = @transform_4, window_bounds = array<i64: 32, 32>}, {pipeline_mode = #tpu.pipeline_mode<synchronous>, transform_indices = @transform_5, window_bounds = array<i64: 10, 48>}, {pipeline_mode = #tpu.pipeline_mode<synchronous>, transform_indices = @transform_6, window_bounds = array<i64: 48, 32>}, {pipeline_mode = #tpu.pipeline_mode<synchronous>, transform_indices = @transform_7, window_bounds = array<i64: 1, 32>}, {pipeline_mode = #tpu.pipeline_mode<synchronous>, transform_indices = @transform_8, window_bounds = array<i64: 32, 32>}, {pipeline_mode = #tpu.pipeline_mode<synchronous>, transform_indices = @transform_9, window_bounds = array<i64: 32, 10>}, {pipeline_mode = #tpu.pipeline_mode<synchronous>, transform_indices = @transform_10, window_bounds = array<i64: 1, 10>}, {pipeline_mode = #tpu.pipeline_mode<synchronous>, transform_indices = @transform_11, window_bounds = array<i64: 2, 10>}, {pipeline_mode = #tpu.pipeline_mode<synchronous>, transform_indices = @transform_12, window_bounds = array<i64: 2, 10>}, {pipeline_mode = #tpu.pipeline_mode<synchronous>, transform_indices = @transform_13, window_bounds = array<i64: 2, 1>}, {pipeline_mode = #tpu.pipeline_mode<synchronous>, transform_indices = @transform_14, window_bounds = array<i64: 2, 10>}, {pipeline_mode = #tpu.pipeline_mode<synchronous>, transform_indices = @transform_15, window_bounds = array<i64: 2, 32>}, {pipeline_mode = #tpu.pipeline_mode<synchronous>, transform_indices = @transform_16, window_bounds = array<i64: 1, 128>}]} {
    %c0 = arith.constant 0 : index
    %c0_0 = arith.constant 0 : index
    %0 = vector.load %arg1[%c0, %c0_0] : memref<8x192xf32, #tpu.memory_space<vmem>>, vector<8x192xf32>
    %c0_1 = arith.constant 0 : index
    %c0_2 = arith.constant 0 : index
    %1 = vector.load %arg3[%c0_1, %c0_2] : memref<192x32xf32, #tpu.memory_space<vmem>>, vector<192x32xf32>
    %cst = arith.constant dense<0.000000e+00> : vector<8x32xf32>
    %2 = tpu.matmul %0, %1, %cst {dimension_numbers = #tpu.dot_dimension_numbers<[1], [0], [0], [1], [0, 0, 1, 1], [], []>} : vector<8x192xf32>, vector<192x32xf32>, vector<8x32xf32> -> vector<8x32xf32>
    %c0_3 = arith.constant 0 : index
    %c0_4 = arith.constant 0 : index
    %3 = vector.load %arg2[%c0_3, %c0_4] : memref<2x8xf32, #tpu.memory_space<vmem>>, vector<2x8xf32>
    %cst_5 = arith.constant dense<0.000000e+00> : vector<2x32xf32>
    %4 = tpu.matmul %3, %2, %cst_5 {dimension_numbers = #tpu.dot_dimension_numbers<[1], [0], [0], [1], [0, 0, 1, 1], [], []>} : vector<2x8xf32>, vector<8x32xf32>, vector<2x32xf32> -> vector<2x32xf32>
    %c0_6 = arith.constant 0 : index
    %c0_7 = arith.constant 0 : index
    %5 = vector.load %arg4[%c0_6, %c0_7] : memref<32x32xf32, #tpu.memory_space<vmem>>, vector<32x32xf32>
    %cst_8 = arith.constant dense<0.000000e+00> : vector<2x32xf32>
    %6 = tpu.matmul %4, %5, %cst_8 {dimension_numbers = #tpu.dot_dimension_numbers<[1], [0], [0], [1], [0, 0, 1, 1], [], []>} : vector<2x32xf32>, vector<32x32xf32>, vector<2x32xf32> -> vector<2x32xf32>
    %c0_9 = arith.constant 0 : index
    %c0_10 = arith.constant 0 : index
    %7 = vector.load %arg5[%c0_9, %c0_10] : memref<32x32xf32, #tpu.memory_space<vmem>>, vector<32x32xf32>
    %cst_11 = arith.constant dense<0.000000e+00> : vector<2x32xf32>
    %8 = tpu.matmul %4, %7, %cst_11 {dimension_numbers = #tpu.dot_dimension_numbers<[1], [0], [0], [1], [0, 0, 1, 1], [], []>} : vector<2x32xf32>, vector<32x32xf32>, vector<2x32xf32> -> vector<2x32xf32>
    %c0_12 = arith.constant 0 : index
    %c0_13 = arith.constant 0 : index
    %9 = vector.load %arg6[%c0_12, %c0_13] : memref<10x48xf32, #tpu.memory_space<vmem>>, vector<10x48xf32>
    %c0_14 = arith.constant 0 : index
    %c0_15 = arith.constant 0 : index
    %10 = vector.load %arg7[%c0_14, %c0_15] : memref<48x32xf32, #tpu.memory_space<vmem>>, vector<48x32xf32>
    %cst_16 = arith.constant dense<0.000000e+00> : vector<10x32xf32>
    %11 = tpu.matmul %9, %10, %cst_16 {dimension_numbers = #tpu.dot_dimension_numbers<[1], [0], [0], [1], [0, 0, 1, 1], [], []>} : vector<10x48xf32>, vector<48x32xf32>, vector<10x32xf32> -> vector<10x32xf32>
    %12 = arith.mulf %11, %11 : vector<10x32xf32>
    %cst_17 = arith.constant dense<0.000000e+00> : vector<10xf32>
    %13 = vector.multi_reduction <add>, %12, %cst_17 [1] : vector<10x32xf32> to vector<10xf32>
    %14 = vector.shape_cast %13 : vector<10xf32> to vector<10x1xf32>
    %cst_18 = arith.constant 9.99999996E-13 : f32
    %15 = vector.broadcast %cst_18 : f32 to vector<10x1xf32>
    %16 = arith.addf %14, %15 : vector<10x1xf32>
    %17 = math.rsqrt %16 : vector<10x1xf32>
    %18 = vector.broadcast %17 : vector<10x1xf32> to vector<10x32xf32>
    %19 = arith.mulf %11, %18 : vector<10x32xf32>
    %c0_19 = arith.constant 0 : index
    %c0_20 = arith.constant 0 : index
    %20 = vector.load %arg8[%c0_19, %c0_20] : memref<1x32xf32, #tpu.memory_space<vmem>>, vector<1x32xf32>
    %21 = vector.broadcast %20 : vector<1x32xf32> to vector<2x32xf32>
    %22 = arith.addf %21, %8 : vector<2x32xf32>
    %c0_21 = arith.constant 0 : index
    %c0_22 = arith.constant 0 : index
    %23 = vector.load %arg9[%c0_21, %c0_22] : memref<32x32xf32, #tpu.memory_space<vmem>>, vector<32x32xf32>
    %cst_23 = arith.constant dense<0.000000e+00> : vector<2x32xf32>
    %24 = tpu.matmul %22, %23, %cst_23 {dimension_numbers = #tpu.dot_dimension_numbers<[1], [0], [0], [1], [0, 0, 1, 1], [], []>} : vector<2x32xf32>, vector<32x32xf32>, vector<2x32xf32> -> vector<2x32xf32>
    %25 = arith.mulf %24, %24 : vector<2x32xf32>
    %cst_24 = arith.constant dense<0.000000e+00> : vector<2xf32>
    %26 = vector.multi_reduction <add>, %25, %cst_24 [1] : vector<2x32xf32> to vector<2xf32>
    %27 = vector.shape_cast %26 : vector<2xf32> to vector<2x1xf32>
    %cst_25 = arith.constant 9.99999996E-13 : f32
    %28 = vector.broadcast %cst_25 : f32 to vector<2x1xf32>
    %29 = arith.addf %27, %28 : vector<2x1xf32>
    %30 = math.rsqrt %29 : vector<2x1xf32>
    %31 = vector.broadcast %30 : vector<2x1xf32> to vector<2x32xf32>
    %32 = arith.mulf %24, %31 : vector<2x32xf32>
    %c0_26 = arith.constant 0 : index
    %c0_27 = arith.constant 0 : index
    %33 = vector.load %arg16[%c0_26, %c0_27] : memref<2x32xf32, #tpu.memory_space<vmem>>, vector<2x32xf32>
    tpu.vector_store %arg16[%c0_26, %c0_27], %32 {strides = array<i32>} : memref<2x32xf32, #tpu.memory_space<vmem>>, vector<2x32xf32>,
    %c0_28 = arith.constant 0 : index
    %c0_29 = arith.constant 0 : index
    %34 = vector.load %arg10[%c0_28, %c0_29] : memref<32x10xf32, #tpu.memory_space<vmem>>, vector<32x10xf32>
    %cst_30 = arith.constant dense<0.000000e+00> : vector<2x10xf32>
    %35 = tpu.matmul %32, %34, %cst_30 {dimension_numbers = #tpu.dot_dimension_numbers<[1], [0], [0], [1], [0, 0, 1, 1], [], []>} : vector<2x32xf32>, vector<32x10xf32>, vector<2x10xf32> -> vector<2x10xf32>
    %c0_31 = arith.constant 0 : index
    %c0_32 = arith.constant 0 : index
    %36 = vector.load %arg11[%c0_31, %c0_32] : memref<1x10xf32, #tpu.memory_space<vmem>>, vector<1x10xf32>
    %37 = vector.broadcast %36 : vector<1x10xf32> to vector<2x10xf32>
    %38 = arith.addf %35, %37 : vector<2x10xf32>
    %c0_33 = arith.constant 0 : index
    %c0_34 = arith.constant 0 : index
    %39 = vector.load %arg15[%c0_33, %c0_34] : memref<2x10xf32, #tpu.memory_space<vmem>>, vector<2x10xf32>
    tpu.vector_store %arg15[%c0_33, %c0_34], %38 {strides = array<i32>} : memref<2x10xf32, #tpu.memory_space<vmem>>, vector<2x10xf32>,
    %40 = arith.mulf %6, %6 : vector<2x32xf32>
    %cst_35 = arith.constant dense<0.000000e+00> : vector<2xf32>
    %41 = vector.multi_reduction <add>, %40, %cst_35 [1] : vector<2x32xf32> to vector<2xf32>
    %42 = vector.shape_cast %41 : vector<2xf32> to vector<2x1xf32>
    %cst_36 = arith.constant 9.99999996E-13 : f32
    %43 = vector.broadcast %cst_36 : f32 to vector<2x1xf32>
    %44 = arith.addf %42, %43 : vector<2x1xf32>
    %45 = math.rsqrt %44 : vector<2x1xf32>
    %46 = vector.broadcast %45 : vector<2x1xf32> to vector<2x32xf32>
    %47 = arith.mulf %6, %46 : vector<2x32xf32>
    %c0_37 = arith.constant 0 : index
    %c0_38 = arith.constant 0 : index
    %48 = vector.load %arg12[%c0_37, %c0_38] : memref<2x10xf32, #tpu.memory_space<vmem>>, vector<2x10xf32>
    %cst_39 = arith.constant dense<0.000000e+00> : vector<2x32xf32>
    %49 = tpu.matmul %48, %19, %cst_39 {dimension_numbers = #tpu.dot_dimension_numbers<[1], [0], [0], [1], [0, 0, 1, 1], [], []>} : vector<2x10xf32>, vector<10x32xf32>, vector<2x32xf32> -> vector<2x32xf32>
    %50 = arith.addf %6, %49 : vector<2x32xf32>
    %51 = arith.mulf %50, %50 : vector<2x32xf32>
    %cst_40 = arith.constant dense<0.000000e+00> : vector<2xf32>
    %52 = vector.multi_reduction <add>, %51, %cst_40 [1] : vector<2x32xf32> to vector<2xf32>
    %53 = vector.shape_cast %52 : vector<2xf32> to vector<2x1xf32>
    %cst_41 = arith.constant 9.99999996E-13 : f32
    %54 = vector.broadcast %cst_41 : f32 to vector<2x1xf32>
    %55 = arith.addf %53, %54 : vector<2x1xf32>
    %56 = math.rsqrt %55 : vector<2x1xf32>
    %57 = vector.broadcast %56 : vector<2x1xf32> to vector<2x32xf32>
    %58 = arith.mulf %50, %57 : vector<2x32xf32>
    %c0_42 = arith.constant 0 : index
    %c0_43 = arith.constant 0 : index
    %59 = vector.load %arg13[%c0_42, %c0_43] : memref<2x10xf32, #tpu.memory_space<vmem>>, vector<2x10xf32>
    %cst_44 = arith.constant dense<0.000000e+00> : vector<2x32xf32>
    %60 = tpu.matmul %59, %19, %cst_44 {dimension_numbers = #tpu.dot_dimension_numbers<[1], [0], [0], [1], [0, 0, 1, 1], [], []>} : vector<2x10xf32>, vector<10x32xf32>, vector<2x32xf32> -> vector<2x32xf32>
    %61 = arith.addf %6, %60 : vector<2x32xf32>
    %62 = arith.mulf %61, %61 : vector<2x32xf32>
    %cst_45 = arith.constant dense<0.000000e+00> : vector<2xf32>
    %63 = vector.multi_reduction <add>, %62, %cst_45 [1] : vector<2x32xf32> to vector<2xf32>
    %64 = vector.shape_cast %63 : vector<2xf32> to vector<2x1xf32>
    %cst_46 = arith.constant 9.99999996E-13 : f32
    %65 = vector.broadcast %cst_46 : f32 to vector<2x1xf32>
    %66 = arith.addf %64, %65 : vector<2x1xf32>
    %67 = math.rsqrt %66 : vector<2x1xf32>
    %68 = vector.broadcast %67 : vector<2x1xf32> to vector<2x32xf32>
    %69 = arith.mulf %61, %68 : vector<2x32xf32>
    %70 = arith.mulf %58, %47 : vector<2x32xf32>
    %cst_47 = arith.constant dense<0.000000e+00> : vector<2xf32>
    %71 = vector.multi_reduction <add>, %70, %cst_47 [1] : vector<2x32xf32> to vector<2xf32>
    %72 = vector.shape_cast %71 : vector<2xf32> to vector<2x1xf32>
    %cst_48 = arith.constant dense<0.000000e+00> : vector<1xf32>
    %73 = vector.multi_reduction <add>, %72, %cst_48 [0] : vector<2x1xf32> to vector<1xf32>
    %74 = vector.shape_cast %73 : vector<1xf32> to vector<1x1xf32>
    %cst_49 = arith.constant 5.000000e-01 : f32
    %75 = vector.broadcast %cst_49 : f32 to vector<1x1xf32>
    %76 = arith.mulf %74, %75 : vector<1x1xf32>
    %c0_50 = arith.constant 0 : index
    %c0_51 = arith.constant 0 : index
    %77 = vector.load %arg14[%c0_50, %c0_51] : memref<2x1xf32, #tpu.memory_space<vmem>>, vector<2x1xf32>
    %78 = vector.broadcast %77 : vector<2x1xf32> to vector<2x32xf32>
    %79 = arith.mulf %69, %78 : vector<2x32xf32>
    %80 = arith.mulf %79, %47 : vector<2x32xf32>
    %cst_52 = arith.constant dense<0.000000e+00> : vector<2xf32>
    %81 = vector.multi_reduction <add>, %80, %cst_52 [1] : vector<2x32xf32> to vector<2xf32>
    %82 = vector.shape_cast %81 : vector<2xf32> to vector<2x1xf32>
    %cst_53 = arith.constant dense<0.000000e+00> : vector<1xf32>
    %83 = vector.multi_reduction <add>, %82, %cst_53 [0] : vector<2x1xf32> to vector<1xf32>
    %84 = vector.shape_cast %83 : vector<1xf32> to vector<1x1xf32>
    %cst_54 = arith.constant 5.000000e-01 : f32
    %85 = vector.broadcast %cst_54 : f32 to vector<1x1xf32>
    %86 = arith.mulf %84, %85 : vector<1x1xf32>
    %87 = tpu.iota {dimensions = array<i32: 1>} : vector<1x128xi32>
    %c0_i32 = arith.constant 0 : i32
    %88 = vector.broadcast %c0_i32 : i32 to vector<1x128xi32>
    %89 = arith.cmpi eq, %87, %88 : vector<1x128xi32>
    %90 = arith.extui %89 : vector<1x128xi1> to vector<1x128xi32>
    %91 = arith.sitofp %90 : vector<1x128xi32> to vector<1x128xf32>
    %92 = vector.broadcast %76 : vector<1x1xf32> to vector<1x128xf32>
    %93 = arith.mulf %92, %91 : vector<1x128xf32>
    %c1_i32 = arith.constant 1 : i32
    %94 = vector.broadcast %c1_i32 : i32 to vector<1x128xi32>
    %95 = arith.cmpi eq, %87, %94 : vector<1x128xi32>
    %96 = arith.extui %95 : vector<1x128xi1> to vector<1x128xi32>
    %97 = arith.sitofp %96 : vector<1x128xi32> to vector<1x128xf32>
    %98 = vector.broadcast %86 : vector<1x1xf32> to vector<1x128xf32>
    %99 = arith.mulf %98, %97 : vector<1x128xf32>
    %100 = arith.addf %93, %99 : vector<1x128xf32>
    %c0_55 = arith.constant 0 : index
    %c0_56 = arith.constant 0 : index
    %101 = vector.load %arg17[%c0_55, %c0_56] : memref<1x128xf32, #tpu.memory_space<vmem>>, vector<1x128xf32>
    tpu.vector_store %arg17[%c0_55, %c0_56], %100 {strides = array<i32>} : memref<1x128xf32, #tpu.memory_space<vmem>>, vector<1x128xf32>,
    return
  }
  func.func @transform_0(%arg0: i32) -> (i32, i32) {
    %c0_i32 = arith.constant 0 : i32
    %c0_i32_0 = arith.constant 0 : i32
    %c0_i32_1 = arith.constant 0 : i32
    return %c0_i32, %c0_i32_0 : i32, i32
  }
  func.func @transform_1(%arg0: i32) -> (i32, i32) {
    %c0_i32 = arith.constant 0 : i32
    %c0_i32_0 = arith.constant 0 : i32
    %c0_i32_1 = arith.constant 0 : i32
    return %c0_i32, %c0_i32_0 : i32, i32
  }
  func.func @transform_2(%arg0: i32) -> (i32, i32) {
    %c0_i32 = arith.constant 0 : i32
    %c0_i32_0 = arith.constant 0 : i32
    %c0_i32_1 = arith.constant 0 : i32
    return %c0_i32, %c0_i32_0 : i32, i32
  }
  func.func @transform_3(%arg0: i32) -> (i32, i32) {
    %c0_i32 = arith.constant 0 : i32
    %c0_i32_0 = arith.constant 0 : i32
    %c0_i32_1 = arith.constant 0 : i32
    return %c0_i32, %c0_i32_0 : i32, i32
  }
  func.func @transform_4(%arg0: i32) -> (i32, i32) {
    %c0_i32 = arith.constant 0 : i32
    %c0_i32_0 = arith.constant 0 : i32
    %c0_i32_1 = arith.constant 0 : i32
    return %c0_i32, %c0_i32_0 : i32, i32
  }
  func.func @transform_5(%arg0: i32) -> (i32, i32) {
    %c0_i32 = arith.constant 0 : i32
    %c0_i32_0 = arith.constant 0 : i32
    %c0_i32_1 = arith.constant 0 : i32
    return %c0_i32, %c0_i32_0 : i32, i32
  }
  func.func @transform_6(%arg0: i32) -> (i32, i32) {
    %c0_i32 = arith.constant 0 : i32
    %c0_i32_0 = arith.constant 0 : i32
    %c0_i32_1 = arith.constant 0 : i32
    return %c0_i32, %c0_i32_0 : i32, i32
  }
  func.func @transform_7(%arg0: i32) -> (i32, i32) {
    %c0_i32 = arith.constant 0 : i32
    %c0_i32_0 = arith.constant 0 : i32
    %c0_i32_1 = arith.constant 0 : i32
    return %c0_i32, %c0_i32_0 : i32, i32
  }
  func.func @transform_8(%arg0: i32) -> (i32, i32) {
    %c0_i32 = arith.constant 0 : i32
    %c0_i32_0 = arith.constant 0 : i32
    %c0_i32_1 = arith.constant 0 : i32
    return %c0_i32, %c0_i32_0 : i32, i32
  }
  func.func @transform_9(%arg0: i32) -> (i32, i32) {
    %c0_i32 = arith.constant 0 : i32
    %c0_i32_0 = arith.constant 0 : i32
    %c0_i32_1 = arith.constant 0 : i32
    return %c0_i32, %c0_i32_0 : i32, i32
  }
  func.func @transform_10(%arg0: i32) -> (i32, i32) {
    %c0_i32 = arith.constant 0 : i32
    %c0_i32_0 = arith.constant 0 : i32
    %c0_i32_1 = arith.constant 0 : i32
    return %c0_i32, %c0_i32_0 : i32, i32
  }
  func.func @transform_11(%arg0: i32) -> (i32, i32) {
    %c0_i32 = arith.constant 0 : i32
    %c0_i32_0 = arith.constant 0 : i32
    %c0_i32_1 = arith.constant 0 : i32
    return %c0_i32, %c0_i32_0 : i32, i32
  }
  func.func @transform_12(%arg0: i32) -> (i32, i32) {
    %c0_i32 = arith.constant 0 : i32
    %c0_i32_0 = arith.constant 0 : i32
    %c0_i32_1 = arith.constant 0 : i32
    return %c0_i32, %c0_i32_0 : i32, i32
  }
  func.func @transform_13(%arg0: i32) -> (i32, i32) {
    %c0_i32 = arith.constant 0 : i32
    %c0_i32_0 = arith.constant 0 : i32
    %c0_i32_1 = arith.constant 0 : i32
    return %c0_i32, %c0_i32_0 : i32, i32
  }
  func.func @transform_14(%arg0: i32) -> (i32, i32) {
    %c0_i32 = arith.constant 0 : i32
    %c0_i32_0 = arith.constant 0 : i32
    %c0_i32_1 = arith.constant 0 : i32
    return %c0_i32, %c0_i32_0 : i32, i32
  }
  func.func @transform_15(%arg0: i32) -> (i32, i32) {
    %c0_i32 = arith.constant 0 : i32
    %c0_i32_0 = arith.constant 0 : i32
    %c0_i32_1 = arith.constant 0 : i32
    return %c0_i32, %c0_i32_0 : i32, i32
  }
  func.func @transform_16(%arg0: i32) -> (i32, i32) {
    %c0_i32 = arith.constant 0 : i32
    %c0_i32_0 = arith.constant 0 : i32
    %c0_i32_1 = arith.constant 0 : i32
    return %c0_i32, %c0_i32_0 : i32, i32
  }
}

</mosaic_0001>

<bundles_post_ra>
// kernel: lore_forward.1
= control target key start
LH: loop header
LB: loop body
LE: loop exit
PB: predicated region body
PF: predicated region fallthrough
CT: control target
= control target key end

     0   :  { %s914_s0 = inlined_call_operand.vmem [shape: f32[8,192], index: 0, kind: input, shape index: {}]   ;;  %s915_s1 = inlined_call_operand.vmem [shape: f32[2,8], index: 1, kind: input, shape index: {}]   ;;  %s916_s2 = inlined_call_operand.vmem [shape: f32[192,32], index: 2, kind: input, shape index: {}]   ;;  %s917_s3 = inlined_call_operand.vmem [shape: f32[32,32], index: 3, kind: input, shape index: {}]   ;;  %s918_s4 = inlined_call_operand.vmem [shape: f32[32,32], index: 4, kind: input, shape index: {}]   ;;  %s919_s5 = inlined_call_operand.vmem [shape: f32[10,48], index: 5, kind: input, shape index: {}]   ;;  %s920_s6 = inlined_call_operand.vmem [shape: f32[48,32], index: 6, kind: input, shape index: {}]   ;;  %s921_s7 = inlined_call_operand.vmem [shape: f32[1,32], index: 7, kind: input, shape index: {}]   ;;  %s922_s8 = inlined_call_operand.vmem [shape: f32[32,32], index: 8, kind: input, shape index: {}]   ;;  %s923_s9 = inlined_call_operand.vmem [shape: f32[32,10], index: 9, kind: input, shape index: {}]   ;;  %s924_s10 = inlined_call_operand.vmem [shape: f32[1,10], index: 10, kind: input, shape index: {}]   ;;  %s925_s11 = inlined_call_operand.vmem [shape: f32[2,10], index: 11, kind: input, shape index: {}]   ;;  %s926_s12 = inlined_call_operand.vmem [shape: f32[2,10], index: 12, kind: input, shape index: {}]   ;;  %s927_s13 = inlined_call_operand.vmem [shape: f32[2,1], index: 13, kind: input, shape index: {}]   ;;  %s928_s14 = inlined_call_operand.hbm [shape: f32[2,10], index: 14, kind: output, shape index: {0}]   ;;  %s929_s15 = inlined_call_operand.hbm [shape: f32[2,32], index: 15, kind: output, shape index: {1}]   ;;  %s930_s16 = inlined_call_operand.vmem [shape: f32[1,128], index: 16, kind: output, shape index: {2}]  }
   0x1   :  { %932 = sst [smem:[#allocation8_spill]] %s914_s0 }
   0x2   :  { %22 = vsyncpa [#allocation3], 0  ;;  %v69_v0 = vld [vmem:[%s916_s2 + $0x78] sm:$0xff]  ;;  %v68_v1 = vld [vmem:[%s916_s2 + $0x70] sm:$0xff] }
   0x3   :  { %82 = vmatpush.msra.mxu0 %v69_v0  ;;  %v67_v2 = vld [vmem:[%s916_s2 + $0x68] sm:$0xff]  ;;  %v77_v3 = vld [vmem:[%s916_s2 + $0xb8] sm:$0xff]  ;;  %v76_v4 = vld [vmem:[%s916_s2 + $0xb0] sm:$0xff] }
   0x4   :  { %v66_v5 = vld [vmem:[%s916_s2 + $0x60] sm:$0xff]  ;;  %110 = vmatpush.msra.mxu1 %v77_v3  ;;  %v75_v6 = vld [vmem:[%s916_s2 + $0xa8] sm:$0xff]  ;;  %v65_v7 = vld [vmem:[%s916_s2 + $0x58] sm:$0xff] }
   0x5   :  { %83 = vmatpush.msra.mxu0 %v68_v1  ;;  %v74_v8 = vld [vmem:[%s916_s2 + $0xa0] sm:$0xff]  ;;  %v64_v9 = vld [vmem:[%s916_s2 + $0x50] sm:$0xff]  ;;  %v73_v10 = vld [vmem:[%s916_s2 + $0x98] sm:$0xff] }
   0x6   :  { %111 = vmatpush.msra.mxu1 %v76_v4 }
   0x7   :  { %84 = vmatpush.msra.mxu0 %v67_v2 }
   0x8   :  { %112 = vmatpush.msra.mxu1 %v75_v6 }
   0x9   :  { %85 = vmatpush.msra.mxu0 %v66_v5 }
   0xb   :  { %86 = vmatpush.msra.mxu0 %v65_v7 }
   0xc   :  { %23 = vsyncpa [#allocation5], 0  ;;  %v63_v11 = vld [vmem:[%s916_s2 + $0x48] sm:$0xff]  ;;  %113 = vmatpush.msra.mxu1 %v74_v8  ;;  %v72_v12 = vld [vmem:[%s916_s2 + $0x90] sm:$0xff]  ;;  %s933_s29 = sld [smem:[#allocation8_spill]]  ;;  %vm78_vm0 = vcmask 523264  }
   0xd   :  { %87 = vmatpush.msra.mxu0 %v64_v9  ;;  %v62_v13 = vld [vmem:[%s916_s2 + $0x40] sm:$0xff]  ;;  %v71_v14 = vld [vmem:[%s916_s2 + $0x88] sm:$0xff]  ;;  %v61_v15 = vld [vmem:[%s916_s2 + $0x38] sm:$0xff]  ;;  %vm123_vm1 = vcmask 64512   ;;  %vm151_vm2 = vcmask 261120   ;;  %vm207_vm3 = vcmask 392192  }
   0xe   :  { %114 = vmatpush.msra.mxu1 %v73_v10  ;;  %v70_v16 = vld [vmem:[%s916_s2 + $0x80] sm:$0xff]  ;;  %v60_v17 = vld [vmem:[%s916_s2 + $0x30] sm:$0xff]  ;;  %v59_v19 = vld [vmem:[%s916_s2 + $0x28] sm:$0xff]  ;;  %vm242_vm4 = vcmask 254976   ;;  %vm373_vm14 = vcmask 1041408   ;;  %vm369_vm15 = vcmask 80896  }
   0xf   :  { %88 = vmatpush.msra.mxu0 %v63_v11  ;;  %v58_v20 = vld [vmem:[%s916_s2 + $0x20] sm:$0xff]  ;;  %v57_v21 = vld [vmem:[%s916_s2 + $0x18] sm:$0xff]  ;;  %v56_v22 = vld [vmem:[%s916_s2 + $0x10] sm:$0xff]  ;;  %s505_s28 = sshll.u32 %s928_s14, 4  ;;  %s621_s30 = smov [#allocation4]   ;;  %s506_s28 = int_to_ptr.hbm [resolvable:$true] %s505_s28 }
  0x10   :  { %115 = vmatpush.msra.mxu1 %v72_v12  ;;  %v55_v23 = vld [vmem:[%s916_s2 + $0x8] sm:$0xff]  ;;  %v54_v24 = vld [vmem:[%s916_s2] sm:$0xff]  ;;  %v150_v26 = vld [vmem:[%s917_s3 + $0x18] sm:$0xff]  ;;  %s514_s0 = sshll.u32 %s621_s30, 4  ;;  %s516_s18 = sshll.u32 %s929_s15, 4  ;;  %s515_s0 = int_to_ptr.vmem [resolvable:$true] %s514_s0  ;;  %s517_s18 = int_to_ptr.hbm [resolvable:$true] %s516_s18 }
  0x11   :  { %89 = vmatpush.msra.mxu0 %v62_v13  ;;  %v149_v27 = vld [vmem:[%s917_s3 + $0x10] sm:$0xff]  ;;  %167 = vmatpush.msra.mxu3 %v150_v26  ;;  %v148_v28 = vld [vmem:[%s917_s3 + $0x8] sm:$0xff]  ;;  %v147_v29 = vld [vmem:[%s917_s3] sm:$0xff] }
  0x12   :  { %116 = vmatpush.msra.mxu1 %v71_v14  ;;  %v53_v18 = vld [vmem:[%s933_s29 + $0x8] sm:$0xff]  ;;  %v52_v25 = vld [vmem:[%s933_s29] sm:$0xff]  ;;  %v178_v35 = vld [vmem:[%s918_s4 + $0x18] sm:$0xff] }
  0x13   :  { %90 = vmatpush.msra.mxu0 %v61_v15  ;;  %168 = vmatpush.msra.mxu3 %v149_v27  ;;  %v206_v30 = vld [vmem:[%s920_s6 + $0x28] sm:$0xff]  ;;  %v122_v34 = vld [vmem:[%s915_s1] sm:$0x3]  ;;  %v177_v36 = vld [vmem:[%s918_s4 + $0x10] sm:$0xff] }
  0x14   :  { %117 = vmatpush.msra.mxu1 %v70_v16  ;;  %v176_v37 = vld [vmem:[%s918_s4 + $0x8] sm:$0xff]  ;;  %v175_v38 = vld [vmem:[%s918_s4] sm:$0xff]  ;;  %v204_v40 = vld [vmem:[%s920_s6 + $0x18] sm:$0xff] }
  0x15   :  { %91 = vmatpush.msra.mxu0 %v60_v17  ;;  %534 = vmatmul.msk.f32.vlgmr.msra.gmra.mxu1 %vm78_vm0, %v53_v18  ;;  %v205_v39 = vld [vmem:[%s920_s6 + $0x20] sm:$0xff]  ;;  %v203_v41 = vld [vmem:[%s920_s6 + $0x10] sm:$0xff]  ;;  %v202_v42 = vld [vmem:[%s920_s6 + $0x8] sm:$0xff]  ;;  %vm350_vm0 = vcmask 74752  }
  0x16   :  { %169 = vmatpush.msra.mxu3 %v148_v28  ;;  %v201_v43 = vld [vmem:[%s920_s6] sm:$0xff]  ;;  %v278_v44 = vld [vmem:[%s922_s8 + $0x18] sm:$0xff]  ;;  %v277_v45 = vld [vmem:[%s922_s8 + $0x10] sm:$0xff] }
  0x17   :  { %92 = vmatpush.msra.mxu0 %v59_v19  ;;  %v199_v47 = vld [vmem:[%s919_s5] sm:$0xff]  ;;  %v276_v48 = vld [vmem:[%s922_s8 + $0x8] sm:$0xff]  ;;  %v322_v2 = vld [vmem:[%s923_s9 + $0x18] sm:$0xff] }
  0x18   :  { %170 = vmatpush.msra.mxu3 %v147_v29  ;;  %v275_v49 = vld [vmem:[%s922_s8] sm:$0xff]  ;;  %v200_v50 = vld [vmem:[%s919_s5 + $0x8] sm:$0x3]  ;;  %342 = vmatpush.msrb.mxu1 %v322_v2  ;;  %v321_v3 = vld [vmem:[%s923_s9 + $0x10] sm:$0xff] }
  0x19   :  { %93 = vmatpush.msra.mxu0 %v58_v20  ;;  %v553_v51 = vld [vmem:[%s921_s7] ss:$0 sm:$0xff]  ;;  %v320_v4 = vld [vmem:[%s923_s9 + $0x8] sm:$0xff] }
  0x1a   :  { %224 = vmatpush.msrb.mxu3 %v206_v30  ;;  %343 = vmatpush.msrb.mxu1 %v321_v3  ;;  %v319_v5 = vld [vmem:[%s923_s9] sm:$0xff] }
  0x1b   :  { %94 = vmatpush.msra.mxu0 %v57_v21 }
  0x1c   :  { %225 = vmatpush.msrb.mxu3 %v205_v39  ;;  %344 = vmatpush.msrb.mxu1 %v320_v4  ;;  %v619_v39 = vmov 0  }
  0x1d   :  { %95 = vmatpush.msra.mxu0 %v56_v22  ;;  %552 = vset.pattern.permute.xlu0 %v619_v39 }
  0x1e   :  { %226 = vmatpush.msrb.mxu3 %v204_v40  ;;  %345 = vmatpush.msrb.mxu1 %v319_v5  ;;  %v554_v40 = vld [vmem:[%s924_s10] ss:$0 sm:$0xff]  ;;  %s620_s10 = smov [#allocation2]  }
  0x1f   :  { %96 = vmatpush.msra.mxu0 %v55_v23 }
  0x20   :  { %227 = vmatpush.msrb.mxu3 %v203_v41 }
  0x21   :  { %97 = vmatpush.msra.mxu0 %v54_v24 }
  0x22   :  { %98 = vmatmul.f32.vlgmr.msra.gmra.mxu0 %v52_v25  ;;  %228 = vmatpush.msrb.mxu3 %v202_v42 }
  0x24   :  { %229 = vmatpush.msrb.mxu3 %v201_v43 }
  0x92   :  { %v119_v31 = vpop.f32.mrf.mxu1 }
  0x9f   :  { %v99_v32 = vpop.f32.mrf.mxu0 }
  0xa0   :  { %v120_v33 = vadd.f32 %v119_v31, %v99_v32 }
  0xa2   :  { %142 = vmatpush.msra.mxu2 %v120_v33 }
  0xa3   :  { %535 = vmatmul.msk.f32.vlgmr.msra.gmra.mxu2 %vm123_vm1, %v122_v34 }
  0xa4   :  { %191 = vmatpush.msrb.mxu2 %v178_v35 }
  0xa6   :  { %192 = vmatpush.msrb.mxu2 %v177_v36  ;;  %v368_v36 = vld [vmem:[%s925_s11] sm:$0x3]  ;;  %s503_s11 = sshll.u32 %s620_s10, 4  ;;  %s504_s11 = int_to_ptr.vmem [resolvable:$true] %s503_s11 }
  0xa8   :  { %193 = vmatpush.msrb.mxu2 %v176_v37  ;;  %v414_v37 = vld [vmem:[%s926_s12] sm:$0x3] }
  0xaa   :  { %194 = vmatpush.msrb.mxu2 %v175_v38  ;;  %v467_v38 = vld [vmem:[%s927_s13] sm:$0x3] }
  0xac   :  { %294 = vmatpush.msra.mxu2 %v278_v44 }
  0xae   :  { %295 = vmatpush.msra.mxu2 %v277_v45 }
  0xb0   :  { %296 = vmatpush.msra.mxu2 %v276_v48 }
  0xb2   :  { %297 = vmatpush.msra.mxu2 %v275_v49 }
 0x126   :  { %v144_v46 = vpop.f32.mrf.mxu2 }
 0x127   :  { %536 = vmatmul.msk.f32.vlgmr.msra.gmra.mxu3 %vm151_vm2, %v144_v46  ;;  %537 = vmatmul.msk.f32.vlgmr.msrb.gmra.mxu2 %vm151_vm2, %v144_v46 }
 0x12f   :  { %538 = vmatmul.msk.f32.vlgmr.msrb.gmra.mxu3 %vm207_vm3, %v199_v47 }
 0x137   :  { %539 = vmatmul.msk.f32.gmra.mxu3 %vm207_vm3, %v200_v50 }
 0x1aa   :  { %v854_v52 = vpop.f32.mrf.mxu3  ;;  %v196_v53 = vpop.f32.mrf.mxu2 }
 0x1ab   :  { %v274_v54 = vadd.f32 %v553_v51, %v196_v53  ;;  %v352_v55 = vmul.f32 %v854_v52, %v854_v52 }
 0x1ad   :  { %540 = vmatmul.msk.f32.vlgmr.msra.gmra.mxu2 %vm151_vm2, %v274_v54  ;;  %v353_v56 = vsel %vm242_vm4, %v352_v55, 0.0 }
 0x1ae   :  { %354 = vadd.xlane.f32.xlu2 %v353_v56 }
 0x1b2   :  { %v860_v57 = vpop.f32.mrf.mxu3 }
 0x1b3   :  { %v237_v58 = vmul.f32 %v860_v57, %v860_v57 }
 0x1b5   :  { %v239_v59 = vsel %vm151_vm2, %v237_v58, 0.0 }
 0x1b6   :  { %240 = vadd.xlane.f32.xlu1 %v239_v59 }
 0x1ba   :  { %v234_v62 = vpop.f32.mrf.mxu3 }
 0x1bb   :  { %v238_v0 = vmul.f32 %v234_v62, %v234_v62 }
 0x1bd   :  { %v243_v1 = vsel %vm242_vm4, %v238_v0, 0.0 }
 0x221   :  { %v355_v51 = vpop.xlane.xlu2 %354 }
 0x222   :  { %v356_v53 = vadd.f32 1e-12, %v355_v51 }
 0x224   :  { %vm363_vm3 = vweird.f32 %v356_v53 }
 0x229   :  { %v241_v6 = vpop.xlane.xlu1 %240 }
 0x22a   :  { %v246_v7 = vadd.f32 1e-12, %v241_v6 }
 0x22c   :  { %555 = vrsqrt.f32 %v246_v7  ;;  %vm254_vm8 = vweird.f32 %v246_v7 }
 0x230   :  { %v299_v60 = vpop.f32.mrf.mxu2 }
 0x231   :  { %v302_v61 = vmul.f32 %v299_v60, %v299_v60 }
 0x232   :  { %v556_v10 = vpop.eup %555 }
 0x233   :  { %v303_v63 = vsel %vm242_vm4, %v302_v61, 0.0  ;;  %v249_v11 = vmul.f32 %v556_v10, %v246_v7  ;;  %vm255_vm9 = vweird.f32 %v556_v10 }
 0x234   :  { %304 = vadd.xlane.f32.xlu0 %v303_v63  ;;  %vm256_vm11 = vmor %vm254_vm8, %vm255_vm9 }
 0x235   :  { %v250_v16 = vmul.f32 %v556_v10, %v249_v11 }
 0x237   :  { %v251_v19 = vmul.f32 0.5, %v250_v16 }
 0x239   :  { %v252_v24 = vsub.f32 1.5, %v251_v19 }
 0x23b   :  { %v253_v30 = vmul.f32 %v556_v10, %v252_v24 }
 0x23c   :  { %244 = vadd.xlane.f32.xlu0 %v243_v1 }
 0x23d   :  { %v257_v33 = vsel %vm256_vm11, %v556_v10, %v253_v30 }
 0x23e   :  { %v268_v35 = vmul.f32 %v257_v33, %v860_v57 }
 0x250   :  { %470 = vperm.xlu0 %552, %v467_v38  }
 0x2a7   :  { %v305_v8 = vpop.xlane.xlu0 %304 }
 0x2a8   :  { %v306_v9 = vadd.f32 1e-12, %v305_v8 }
 0x2aa   :  { %557 = vrsqrt.f32 %v306_v9  ;;  %vm313_vm6 = vweird.f32 %v306_v9 }
 0x2af   :  { %v245_v12 = vpop.xlane.xlu0 %244 }
 0x2b0   :  { %v558_v13 = vpop.eup %557  ;;  %v247_v14 = vadd.f32 1e-12, %v245_v12 }
 0x2b1   :  { %v308_v15 = vmul.f32 %v558_v13, %v306_v9  ;;  %vm314_vm5 = vweird.f32 %v558_v13 }
 0x2b2   :  { %559 = vrsqrt.f32 %v247_v14  ;;  %vm315_vm7 = vmor %vm313_vm6, %vm314_vm5  ;;  %vm264_vm12 = vweird.f32 %v247_v14 }
 0x2b3   :  { %v309_v17 = vmul.f32 %v558_v13, %v308_v15  ;;  %561 = vrsqrt.f32 %v356_v53 }
 0x2b5   :  { %v310_v18 = vmul.f32 0.5, %v309_v17 }
 0x2b7   :  { %v311_v20 = vsub.f32 1.5, %v310_v18 }
 0x2b8   :  { %v560_v21 = vpop.eup %559 }
 0x2b9   :  { %v312_v22 = vmul.f32 %v558_v13, %v311_v20  ;;  %v259_v23 = vmul.f32 %v560_v21, %v247_v14  ;;  %vm265_vm10 = vweird.f32 %v560_v21  ;;  %v562_v54 = vpop.eup %561 }
 0x2ba   :  { %vm266_vm13 = vmor %vm264_vm12, %vm265_vm10  ;;  %v358_v55 = vmul.f32 %v562_v54, %v356_v53  ;;  %vm364_vm1 = vweird.f32 %v562_v54 }
 0x2bb   :  { %v316_v25 = vsel %vm315_vm7, %v558_v13, %v312_v22  ;;  %v260_v26 = vmul.f32 %v560_v21, %v259_v23  ;;  %vm365_vm5 = vmor %vm363_vm3, %vm364_vm1 }
 0x2bc   :  { %v317_v27 = vmul.f32 %v316_v25, %v299_v60  ;;  %v359_v58 = vmul.f32 %v562_v54, %v358_v55 }
 0x2bd   :  { %v261_v28 = vmul.f32 0.5, %v260_v26 }
 0x2be   :  { %541 = vmatmul.msk.f32.vlgmr.msrb.gmra.mxu1 %vm151_vm2, %v317_v27  ;;  %318 = vst.msk [vmem:[#allocation4] sm:$0x3] %vm242_vm4, %v317_v27  ;;  %v360_v61 = vmul.f32 0.5, %v359_v58 }
 0x2bf   :  { %v262_v29 = vsub.f32 1.5, %v261_v28  ;;  %519 = dma.vmem_to_hbm [thread:$0]  %s515_s0, 32, %s517_s18, [#allocation5]  }
 0x2c0   :  { %v361_v0 = vsub.f32 1.5, %v360_v61 }
 0x2c1   :  { %v263_v31 = vmul.f32 %v560_v21, %v262_v29  ;;  %v486_v29 = vlaneseq }
 0x2c2   :  { %v362_v6 = vmul.f32 %v562_v54, %v361_v0  ;;  %v471_v11 = vpop.permute.xlu0 %470 }
 0x2c3   :  { %v267_v32 = vsel %vm266_vm13, %v560_v21, %v263_v31 }
 0x2c4   :  { %v269_v34 = vmul.f32 %v267_v32, %v234_v62  ;;  %v366_v12 = vsel %vm365_vm5, %v562_v54, %v362_v6 }
 0x2c5   :  { %v367_v16 = vmul.f32 %v366_v12, %v854_v52 }
 0x2c6   :  { %542 = vmatpush.msk.msrb.mxu2 %vm373_vm14, %v269_v34  ;;  %544 = vmatpush.msk.msra.mxu1 %vm373_vm14, %v269_v34  ;;  %v487_v34 = vand.u32 127, %v486_v29 }
 0x2c8   :  { %392 = vmatpush.msrb.mxu2 %v268_v35  ;;  %433 = vmatpush.msra.mxu1 %v268_v35  ;;  %vm488_vm11 = vcmp.eq.s32.totalorder %v487_v34, 0 }
 0x2c9   :  { %543 = vmatmul.msk.f32.vlgmr.msrb.gmra.mxu2 %vm369_vm15, %v368_v36  ;;  %545 = vmatmul.msk.f32.vlgmr.msra.gmra.mxu1 %vm369_vm15, %v414_v37 }
 0x33b   :  { %v347_v41 = vpop.f32.mrf.mxu1 }
 0x33c   :  { %v348_v42 = vadd.f32 %v554_v40, %v347_v41 }
 0x33e   :  { %351 = vst.msk [vmem:[#allocation2] sm:$0x3] %vm350_vm0, %v348_v42  ;;  %v622_v42 = vmov 0.0  }
 0x33f   :  { %508 = dma.vmem_to_hbm [thread:$0]  %s504_s11, 32, %s506_s28, [#allocation3]  }
 0x346   :  { %v435_v43 = vpop.f32.mrf.mxu1 }
 0x347   :  { %v438_v44 = vadd.f32 %v435_v43, %v854_v52 }
 0x349   :  { %v439_v45 = vmul.f32 %v438_v44, %v438_v44 }
 0x34b   :  { %v440_v46 = vsel %vm242_vm4, %v439_v45, 0.0 }
 0x34c   :  { %441 = vadd.xlane.f32.xlu1 %v440_v46  ;;  %v394_v47 = vpop.f32.mrf.mxu2 }
 0x34d   :  { %v397_v48 = vadd.f32 %v394_v47, %v854_v52 }
 0x34f   :  { %v398_v49 = vmul.f32 %v397_v48, %v397_v48 }
 0x351   :  { %v399_v50 = vsel %vm242_vm4, %v398_v49, 0.0 }
 0x352   :  { %400 = vadd.xlane.f32.xlu2 %v399_v50 }
 0x3bf   :  { %v442_v56 = vpop.xlane.xlu1 %441 }
 0x3c0   :  { %v443_v57 = vadd.f32 1e-12, %v442_v56 }
 0x3c2   :  { %563 = vrsqrt.f32 %v443_v57  ;;  %vm450_vm6 = vweird.f32 %v443_v57 }
 0x3c5   :  { %v401_v59 = vpop.xlane.xlu2 %400 }
 0x3c6   :  { %v402_v60 = vadd.f32 1e-12, %v401_v59 }
 0x3c8   :  { %v564_v62 = vpop.eup %563  ;;  %565 = vrsqrt.f32 %v402_v60  ;;  %vm409_vm9 = vweird.f32 %v402_v60 }
 0x3c9   :  { %v445_v63 = vmul.f32 %v564_v62, %v443_v57  ;;  %vm451_vm2 = vweird.f32 %v564_v62 }
 0x3ca   :  { %vm452_vm7 = vmor %vm450_vm6, %vm451_vm2 }
 0x3cb   :  { %v446_v1 = vmul.f32 %v564_v62, %v445_v63 }
 0x3cd   :  { %v447_v2 = vmul.f32 0.5, %v446_v1 }
 0x3ce   :  { %v566_v3 = vpop.eup %565 }
 0x3cf   :  { %v448_v4 = vsub.f32 1.5, %v447_v2  ;;  %v404_v5 = vmul.f32 %v566_v3, %v402_v60  ;;  %vm410_vm8 = vweird.f32 %v566_v3 }
 0x3d0   :  { %vm411_vm10 = vmor %vm409_vm9, %vm410_vm8 }
 0x3d1   :  { %v405_v7 = vmul.f32 %v566_v3, %v404_v5  ;;  %v449_v8 = vmul.f32 %v564_v62, %v448_v4 }
 0x3d3   :  { %v406_v9 = vmul.f32 0.5, %v405_v7  ;;  %v453_v10 = vsel %vm452_vm7, %v564_v62, %v449_v8 }
 0x3d4   :  { %v454_v13 = vmul.f32 %v453_v10, %v438_v44  ;;  %v546_v44 = vsel %vm488_vm11, 1.0, %v622_v42 }
 0x3d5   :  { %v407_v14 = vsub.f32 1.5, %v406_v9 }
 0x3d6   :  { %v473_v15 = vmul.f32 %v471_v11, %v454_v13 }
 0x3d7   :  { %v408_v17 = vmul.f32 %v566_v3, %v407_v14 }
 0x3d8   :  { %v474_v18 = vmul.f32 %v473_v15, %v367_v16 }
 0x3d9   :  { %v412_v19 = vsel %vm411_vm10, %v566_v3, %v408_v17 }
 0x3da   :  { %v475_v20 = vsel %vm242_vm4, %v474_v18, 0.0  ;;  %v413_v21 = vmul.f32 %v412_v19, %v397_v48 }
 0x3db   :  { %476 = vadd.xlane.f32.xlu2 %v475_v20 }
 0x3dc   :  { %v455_v22 = vmul.f32 %v413_v21, %v367_v16 }
 0x3de   :  { %v456_v23 = vsel %vm242_vm4, %v455_v22, 0.0  ;;  %vm492_vm4 = vcmp.eq.s32.totalorder %v487_v34, 1 }
 0x3df   :  { %457 = vadd.xlane.f32.xlu1 %v456_v23  ;;  %v547_v43 = vsel %vm492_vm4, 1.0, %v622_v42 }
 0x44e   :  { %v477_v52 = vpop.xlane.xlu2 %476 }
 0x44f   :  { %v478_v24 = vsel %vm373_vm14, %v477_v52, 0.0 }
 0x450   :  { %v479_v25 = vrot.slane %v478_v24, 4 }
 0x452   :  { %v480_v26 = vadd.f32 %v479_v25, %v478_v24  ;;  %v458_v27 = vpop.xlane.xlu1 %457 }
 0x453   :  { %v459_v28 = vsel %vm373_vm14, %v458_v27, 0.0 }
 0x454   :  { %v481_v30 = vrot.slane %v480_v26, 2  ;;  %v460_v31 = vrot.slane %v459_v28, 4 }
 0x456   :  { %v482_v32 = vadd.f32 %v481_v30, %v480_v26  ;;  %v461_v33 = vadd.f32 %v460_v31, %v459_v28 }
 0x458   :  { %v483_v35 = vrot.slane %v482_v32, 1  ;;  %v462_v36 = vrot.slane %v461_v33, 2 }
 0x45a   :  { %v484_v37 = vadd.f32 %v483_v35, %v482_v32  ;;  %v463_v38 = vadd.f32 %v462_v36, %v461_v33 }
 0x45c   :  { %v464_v39 = vrot.slane %v463_v38, 1  ;;  %v485_v40 = vmul.f32 0.5, %v484_v37 }
 0x45e   :  { %v465_v41 = vadd.f32 %v464_v39, %v463_v38  ;;  %v495_v46 = vmul.f32 %v547_v43, %v485_v40 }
 0x460   :  { %v466_v45 = vmul.f32 0.5, %v465_v41 }
 0x462   :  { %v491_v47 = vmul.f32 %v546_v44, %v466_v45 }
 0x464   :  { %v496_v48 = vadd.f32 %v495_v46, %v491_v47 }
 0x466   :  { %497 = vst [vmem:[%s930_s16] sm:$0x1] %v496_v48 }
 0x467   :  { %615 = dma.done.wait [#allocation3], 32  }
 0x468   :  { %616 = vsyncadd [#allocation3], 4294967264 }
 0x469   :  { %617 = dma.done.wait [#allocation5], 32  }
 0x46a   :  { %618 = vsyncadd [#allocation5], 4294967264 }
 0x46b   :  { %532 = vsyncpa [#allocation3], 1 }
 0x46c   :  { %533 = vsyncpa [#allocation5], 1 }

</bundles_post_ra>
